<compile_context>
chip_gen: v7x
topology: tpu7x:2x2x1
jax: 0.10.0
libtpu: 0.0.40
codegen_flags: <defaults>
</compile_context>

<pallas_src>
import jax
import jax.numpy as jnp
from jax.experimental import pallas as pl
from jax.experimental.pallas import tpu as pltpu  # noqa: F401  (TPU backend)

EPS = 1e-5


def conv1x1_bn_kernel(w_ref, x_ref, gb_ref, o_ref):
    # w_ref:  (Cout, Cin)  bf16
    # x_ref:  (Cin,  M)    bf16
    # gb_ref: (Cout, 2)    f32   -- column 0 = gamma, column 1 = beta
    # o_ref:  (Cout, M)    f32
    #
    # 1x1 conv == matmul on the MXU.  bf16 operands, explicit f32 accumulate.
    y = jnp.dot(w_ref[...], x_ref[...], preferred_element_type=jnp.float32)

    # BatchNorm2d, training mode: biased per-channel statistics over all
    # N*H*W positions == over the lane axis.  Two-pass (mean, then centered
    # sum of squares); clamp is belt-and-braces before rsqrt.
    inv_m = 1.0 / y.shape[1]
    mean = jnp.sum(y, axis=1, keepdims=True) * inv_m           # (Cout, 1)
    centered = y - mean
    var = jnp.sum(centered * centered, axis=1, keepdims=True) * inv_m
    var = jnp.maximum(var, 0.0)

    inv_std = jax.lax.rsqrt(var + EPS)
    gamma = gb_ref[:, 0:1]                                      # (Cout, 1)
    beta = gb_ref[:, 1:2]                                       # (Cout, 1)

    # Single fused elementwise pass over the (Cout, M) result.
    o_ref[...] = centered * (inv_std * gamma) + beta


def conv1x1_bn(x_nchw, weight, gamma, beta):
    """Fused Conv2d(1x1, bias=False) + BatchNorm2d (training-mode stats).

    x_nchw: (N, Cin, H, W) f32
    weight: (Cout, Cin, 1, 1) or (Cout, Cin) f32
    gamma, beta: (Cout,) f32
    Returns (N, Cout, H, W) f32.
    """
    n, cin, h, w = x_nchw.shape
    cout = weight.shape[0]
    m = n * h * w

    # Channels-first 2-D view.  For N == 1 this is a free reshape of NCHW.
    if n == 1:
        x2d = x_nchw.reshape(cin, m)
    else:
        # TODO(synk): for N > 1 the transpose is an extra HBM round trip; at
        # larger sizes this should become a grid axis with M blocked at 128.
        x2d = jnp.transpose(x_nchw, (1, 0, 2, 3)).reshape(cin, m)

    # bf16 operands for the MXU; BN math stays in f32.
    x2d = x2d.astype(jnp.bfloat16)
    w2d = weight.reshape(cout, cin).astype(jnp.bfloat16)
    gb = jnp.stack(
        [gamma.astype(jnp.float32), beta.astype(jnp.float32)], axis=1
    )  # (Cout, 2)

    out2d = pl.pallas_call(
        conv1x1_bn_kernel,
        out_shape=jax.ShapeDtypeStruct((cout, m), jnp.float32),
        in_specs=[
            pl.BlockSpec((cout, cin), lambda: (0, 0)),
            pl.BlockSpec((cin, m), lambda: (0, 0)),
            pl.BlockSpec((cout, 2), lambda: (0, 0)),
        ],
        out_specs=pl.BlockSpec((cout, m), lambda: (0, 0)),
    )(w2d, x2d, gb)

    # (Cout, M) -> NCHW.  For N == 1 this is again a free reshape.
    if n == 1:
        return out2d.reshape(1, cout, h, w)
    return jnp.transpose(out2d.reshape(cout, n, h, w), (1, 0, 2, 3))


def reference(x_nchw, weight, gamma, beta, matmul_dtype=jnp.float32):
    """Pure-JAX reference: Conv2d(1x1, no bias) + BatchNorm2d (training mode,
    biased batch variance).  `matmul_dtype` lets us mirror the kernel's bf16
    operand choice for a tight correctness check."""
    n, cin, h, w = x_nchw.shape
    cout = weight.shape[0]
    x2d = jnp.transpose(x_nchw, (0, 2, 3, 1)).reshape(-1, cin)
    w2d = weight.reshape(cout, cin)
    y = jnp.dot(
        x2d.astype(matmul_dtype),
        w2d.astype(matmul_dtype).T,
        preferred_element_type=jnp.float32,
        precision=jax.lax.Precision.HIGHEST,
    )
    mean = jnp.mean(y, axis=0, keepdims=True)
    var = jnp.mean((y - mean) ** 2, axis=0, keepdims=True)
    out = (y - mean) / jnp.sqrt(var + EPS) * gamma.reshape(1, -1) + beta.reshape(1, -1)
    return jnp.transpose(out.reshape(n, h, w, cout), (0, 3, 1, 2)).astype(jnp.float32)


if __name__ == "__main__":
    key = jax.random.PRNGKey(0)
    k_x, k_w, k_g, k_b = jax.random.split(key, 4)

    # Shapes implied by the module: Conv2d(480 -> 80, 1x1), input [1, 480, 14, 14]
    N, CIN, H, W = 1, 480, 14, 14
    COUT = 80

    x = jax.random.normal(k_x, (N, CIN, H, W), dtype=jnp.float32)

    # Conv2d weight (kaiming-ish uniform scale), non-trivial BN affine params
    # so the gamma/beta path is actually exercised.
    bound = 1.0 / jnp.sqrt(CIN)  # 1x1 kernel -> fan_in = CIN
    conv_w = jax.random.uniform(
        k_w, (COUT, CIN, 1, 1), dtype=jnp.float32, minval=-bound, maxval=bound
    )
    bn_gamma = jax.random.uniform(
        k_g, (COUT,), dtype=jnp.float32, minval=0.5, maxval=1.5
    )
    bn_beta = 0.5 * jax.random.normal(k_b, (COUT,), dtype=jnp.float32)

    # TODO(synk): running_mean / running_var buffer updates (momentum=0.1) are
    # not emitted; only the training-mode normalized output is produced.

    out = conv1x1_bn(x, conv_w, bn_gamma, bn_beta)
    out = jax.block_until_ready(out)
    assert out.shape == (N, COUT, H, W)

    # Tight check against a reference that mirrors the kernel's precision
    # choice (bf16 operands, f32 accumulation).
    ref_mirror = reference(x, conv_w, bn_gamma, bn_beta, matmul_dtype=jnp.bfloat16)
    assert jnp.allclose(out, ref_mirror, atol=2e-3, rtol=2e-3), (
        float(jnp.max(jnp.abs(out - ref_mirror)))
    )

    # Looser sanity check against the full-f32 forward semantics of the module
    # (difference is only the bf16 quantization of the matmul operands).
    ref_f32 = reference(x, conv_w, bn_gamma, bn_beta, matmul_dtype=jnp.float32)
    assert jnp.allclose(out, ref_f32, atol=3e-2, rtol=3e-2), (
        float(jnp.max(jnp.abs(out - ref_f32)))
    )

    print("KERNEL_OK")
</pallas_src>

<mosaic_0001>
module attributes {stable_mosaic.version = 11 : i64} {
  func.func @conv1x1_bn_kernel(%arg0: memref<80x480xbf16, #tpu.memory_space<vmem>>, %arg1: memref<480x196xbf16, #tpu.memory_space<vmem>>, %arg2: memref<80x2xf32, #tpu.memory_space<vmem>>, %arg3: memref<80x196xf32, #tpu.memory_space<vmem>>) attributes {dimension_semantics = [], scalar_prefetch = 0 : i64, scratch_operands = 0 : i64, tpu.core_type = #tpu.core_type<tc>} {
    %c0 = arith.constant 0 : index
    %c0_0 = arith.constant 0 : index
    %0 = vector.load %arg0[%c0, %c0_0] : memref<80x480xbf16, #tpu.memory_space<vmem>>, vector<80x480xbf16>
    %c0_1 = arith.constant 0 : index
    %c0_2 = arith.constant 0 : index
    %1 = vector.load %arg1[%c0_1, %c0_2] : memref<480x196xbf16, #tpu.memory_space<vmem>>, vector<480x196xbf16>
    %cst = arith.constant dense<0.000000e+00> : vector<80x196xf32>
    %2 = tpu.matmul %0, %1, %cst {dimension_numbers = #tpu.dot_dimension_numbers<[1], [0], [0], [1], [0, 0, 1, 1], [], []>} : vector<80x480xbf16>, vector<480x196xbf16>, vector<80x196xf32> -> vector<80x196xf32>
    %cst_3 = arith.constant dense<0.000000e+00> : vector<80xf32>
    %3 = vector.multi_reduction <add>, %2, %cst_3 [1] : vector<80x196xf32> to vector<80xf32>
    %4 = vector.shape_cast %3 : vector<80xf32> to vector<80x1xf32>
    %cst_4 = arith.constant 0.00510204071 : f32
    %5 = vector.broadcast %cst_4 : f32 to vector<80x1xf32>
    %6 = arith.mulf %4, %5 : vector<80x1xf32>
    %7 = vector.broadcast %6 : vector<80x1xf32> to vector<80x196xf32>
    %8 = arith.subf %2, %7 : vector<80x196xf32>
    %9 = arith.mulf %8, %8 : vector<80x196xf32>
    %cst_5 = arith.constant dense<0.000000e+00> : vector<80xf32>
    %10 = vector.multi_reduction <add>, %9, %cst_5 [1] : vector<80x196xf32> to vector<80xf32>
    %11 = vector.shape_cast %10 : vector<80xf32> to vector<80x1xf32>
    %cst_6 = arith.constant 0.00510204071 : f32
    %12 = vector.broadcast %cst_6 : f32 to vector<80x1xf32>
    %13 = arith.mulf %11, %12 : vector<80x1xf32>
    %cst_7 = arith.constant 0.000000e+00 : f32
    %14 = vector.broadcast %cst_7 : f32 to vector<80x1xf32>
    %15 = arith.maximumf %13, %14 : vector<80x1xf32>
    %cst_8 = arith.constant 9.99999974E-6 : f32
    %16 = vector.broadcast %cst_8 : f32 to vector<80x1xf32>
    %17 = arith.addf %15, %16 : vector<80x1xf32>
    %18 = math.rsqrt %17 : vector<80x1xf32>
    %c0_9 = arith.constant 0 : index
    %c0_10 = arith.constant 0 : index
    %19 = vector.load %arg2[%c0_9, %c0_10] : memref<80x2xf32, #tpu.memory_space<vmem>>, vector<80x1xf32>
    %c0_11 = arith.constant 0 : index
    %c1 = arith.constant 1 : index
    %20 = vector.load %arg2[%c0_11, %c1] : memref<80x2xf32, #tpu.memory_space<vmem>>, vector<80x1xf32>
    %21 = arith.mulf %18, %19 : vector<80x1xf32>
    %22 = vector.broadcast %21 : vector<80x1xf32> to vector<80x196xf32>
    %23 = arith.mulf %8, %22 : vector<80x196xf32>
    %24 = vector.broadcast %20 : vector<80x1xf32> to vector<80x196xf32>
    %25 = arith.addf %23, %24 : vector<80x196xf32>
    %c0_12 = arith.constant 0 : index
    %c0_13 = arith.constant 0 : index
    %26 = vector.load %arg3[%c0_12, %c0_13] : memref<80x196xf32, #tpu.memory_space<vmem>>, vector<80x196xf32>
    tpu.vector_store %arg3[%c0_12, %c0_13], %25 {strides = array<i32>} : memref<80x196xf32, #tpu.memory_space<vmem>>, vector<80x196xf32>,
    return
  }
}

</mosaic_0001>

<bundles_post_ra>
// kernel: tpu_custom_call.1
= control target key start
LH: loop header
LB: loop body
LE: loop exit
PB: predicated region body
PF: predicated region fallthrough
CT: control target
= control target key end

     0   :  { %vm491_vm0 = vcmask 785408   ;;  %s1862_s0 = inlined_call_operand.vmem [shape: bf16[80,480], index: 0, kind: input, shape index: {}]   ;;  %s1863_s1 = inlined_call_operand.vmem [shape: bf16[480,196], index: 1, kind: input, shape index: {}]   ;;  %s1864_s2 = inlined_call_operand.vmem [shape: f32[80,2], index: 2, kind: input, shape index: {}]   ;;  %s1865_s3 = inlined_call_operand.hbm [shape: f32[80,196], index: 3, kind: output, shape index: {}]  }
   0x1   :  { %v1156_v0 = vld [vmem:[%s1863_s1 + $0x4] ss:$8 sps:$4 sm:$0xff]   ;;  %v1158_v1 = vld [vmem:[%s1863_s1] ss:$8 sps:$4 sm:$0xff]   ;;  %v1159_v2 = vld [vmem:[%s1863_s1 + $0x14] ss:$8 sps:$4 sm:$0xff]  }
   0x2   :  { %507 = vmatprep.subr.bf16.mxu1 %v1156_v0  ;;  %v1161_v3 = vld [vmem:[%s1863_s1 + $0x10] ss:$8 sps:$4 sm:$0xff]   ;;  %v1162_v4 = vld [vmem:[%s1863_s1 + $0x104] ss:$8 sps:$4 sm:$0xff]   ;;  %v1164_v5 = vld [vmem:[%s1863_s1 + $0x100] ss:$8 sps:$4 sm:$0xff]  }
   0x3   :  { %508 = vmatpush1.bf16.msra.mxu1 %v1158_v1  ;;  %v1165_v6 = vld [vmem:[%s1863_s1 + $0x24] ss:$8 sps:$4 sm:$0xff]   ;;  %590 = vmatprep.subr.bf16.mxu0 %v1162_v4  ;;  %v1168_v7 = vld [vmem:[%s1863_s1 + $0x114] ss:$8 sps:$4 sm:$0xff]   ;;  %v1170_v8 = vld [vmem:[%s1863_s1 + $0x110] ss:$8 sps:$4 sm:$0xff]  }
   0x4   :  { %509 = vmatprep.subr.bf16.mxu1 %v1159_v2  ;;  %591 = vmatpush1.bf16.msra.mxu0 %v1164_v5  ;;  %v1167_v9 = vld [vmem:[%s1863_s1 + $0x20] ss:$8 sps:$4 sm:$0xff]   ;;  %v1171_v10 = vld [vmem:[%s1863_s1 + $0x34] ss:$8 sps:$4 sm:$0xff]   ;;  %v1174_v11 = vld [vmem:[%s1863_s1 + $0x124] ss:$8 sps:$4 sm:$0xff]  }
   0x5   :  { %592 = vmatprep.subr.bf16.mxu0 %v1168_v7  ;;  %v1176_v12 = vld [vmem:[%s1863_s1 + $0x120] ss:$8 sps:$4 sm:$0xff]   ;;  %v1173_v13 = vld [vmem:[%s1863_s1 + $0x30] ss:$8 sps:$4 sm:$0xff]   ;;  %v1180_v14 = vld [vmem:[%s1863_s1 + $0x134] ss:$8 sps:$4 sm:$0xff]  }
   0x6   :  { %v1177_v15 = vld [vmem:[%s1863_s1 + $0x44] ss:$8 sps:$4 sm:$0xff]   ;;  %v1182_v16 = vld [vmem:[%s1863_s1 + $0x130] ss:$8 sps:$4 sm:$0xff]   ;;  %v1179_v17 = vld [vmem:[%s1863_s1 + $0x40] ss:$8 sps:$4 sm:$0xff]  }
   0x7   :  { %510 = vmatpush1.bf16.msra.mxu1 %v1161_v3  ;;  %v1186_v18 = vld [vmem:[%s1863_s1 + $0x144] ss:$8 sps:$4 sm:$0xff]   ;;  %v1183_v19 = vld [vmem:[%s1863_s1 + $0x54] ss:$8 sps:$4 sm:$0xff]   ;;  %v1188_v20 = vld [vmem:[%s1863_s1 + $0x140] ss:$8 sps:$4 sm:$0xff]  }
   0x8   :  { %511 = vmatprep.subr.bf16.mxu1 %v1165_v6  ;;  %593 = vmatpush1.bf16.msra.mxu0 %v1170_v8  ;;  %v1185_v21 = vld [vmem:[%s1863_s1 + $0x50] ss:$8 sps:$4 sm:$0xff]   ;;  %v1192_v22 = vld [vmem:[%s1863_s1 + $0x154] ss:$8 sps:$4 sm:$0xff]   ;;  %v1189_v23 = vld [vmem:[%s1863_s1 + $0x64] ss:$8 sps:$4 sm:$0xff]  }
   0x9   :  { %594 = vmatprep.subr.bf16.mxu0 %v1174_v11  ;;  %v1194_v24 = vld [vmem:[%s1863_s1 + $0x150] ss:$8 sps:$4 sm:$0xff]   ;;  %v1191_v25 = vld [vmem:[%s1863_s1 + $0x60] ss:$8 sps:$4 sm:$0xff]   ;;  %v1198_v26 = vld [vmem:[%s1863_s1 + $0x164] ss:$8 sps:$4 sm:$0xff]  }
   0xa   :  { %v1195_v27 = vld [vmem:[%s1863_s1 + $0x74] ss:$8 sps:$4 sm:$0xff]   ;;  %v1200_v28 = vld [vmem:[%s1863_s1 + $0x160] ss:$8 sps:$4 sm:$0xff]   ;;  %v1197_v29 = vld [vmem:[%s1863_s1 + $0x70] ss:$8 sps:$4 sm:$0xff]  }
   0xb   :  { %512 = vmatpush1.bf16.msra.mxu1 %v1167_v9  ;;  %v1204_v30 = vld [vmem:[%s1863_s1 + $0x174] ss:$8 sps:$4 sm:$0xff]   ;;  %v1201_v31 = vld [vmem:[%s1863_s1 + $0x84] ss:$8 sps:$4 sm:$0xff]   ;;  %v1206_v32 = vld [vmem:[%s1863_s1 + $0x170] ss:$8 sps:$4 sm:$0xff]  }
   0xc   :  { %513 = vmatprep.subr.bf16.mxu1 %v1171_v10  ;;  %595 = vmatpush1.bf16.msra.mxu0 %v1176_v12  ;;  %v1203_v33 = vld [vmem:[%s1863_s1 + $0x80] ss:$8 sps:$4 sm:$0xff]   ;;  %v1210_v34 = vld [vmem:[%s1863_s1 + $0x184] ss:$8 sps:$4 sm:$0xff]   ;;  %v1207_v35 = vld [vmem:[%s1863_s1 + $0x94] ss:$8 sps:$4 sm:$0xff]  }
   0xd   :  { %596 = vmatprep.subr.bf16.mxu0 %v1180_v14  ;;  %v1212_v36 = vld [vmem:[%s1863_s1 + $0x180] ss:$8 sps:$4 sm:$0xff]   ;;  %v1209_v37 = vld [vmem:[%s1863_s1 + $0x90] ss:$8 sps:$4 sm:$0xff]   ;;  %v1216_v38 = vld [vmem:[%s1863_s1 + $0x194] ss:$8 sps:$4 sm:$0xff]  }
   0xe   :  { %v1213_v39 = vld [vmem:[%s1863_s1 + $0xa4] ss:$8 sps:$4 sm:$0xff]   ;;  %v1215_v40 = vld [vmem:[%s1863_s1 + $0xa0] ss:$8 sps:$4 sm:$0xff]   ;;  %v1218_v41 = vld [vmem:[%s1863_s1 + $0x190] ss:$8 sps:$4 sm:$0xff]  }
   0xf   :  { %514 = vmatpush1.bf16.msra.mxu1 %v1173_v13  ;;  %v1222_v42 = vld [vmem:[%s1863_s1 + $0x1a4] ss:$8 sps:$4 sm:$0xff]   ;;  %v1219_v43 = vld [vmem:[%s1863_s1 + $0xb4] ss:$8 sps:$4 sm:$0xff]   ;;  %v1224_v45 = vld [vmem:[%s1863_s1 + $0x1a0] ss:$8 sps:$4 sm:$0xff]  }
  0x10   :  { %515 = vmatprep.subr.bf16.mxu1 %v1177_v15  ;;  %597 = vmatpush1.bf16.msra.mxu0 %v1182_v16  ;;  %v1247_v44 = vld [vmem:[%s1862_s0 + $0xc] ss:$16 sps:$4 sm:$0xff]   ;;  %v1251_v46 = vld [vmem:[%s1862_s0 + $0x4] ss:$16 sps:$4 sm:$0xff]   ;;  %v1221_v47 = vld [vmem:[%s1863_s1 + $0xb0] ss:$8 sps:$4 sm:$0xff]  }
  0x11   :  { %598 = vmatprep.subr.bf16.mxu0 %v1186_v18  ;;  %1120 = vmatprep.mubr.msk.bf16.mxu0 %vm491_vm0, %v1247_v44  ;;  %v1228_v48 = vld [vmem:[%s1863_s1 + $0x1b4] ss:$8 sps:$4 sm:$0xff]   ;;  %v1225_v49 = vld [vmem:[%s1863_s1 + $0xc4] ss:$8 sps:$4 sm:$0xff]   ;;  %v1230_v50 = vld [vmem:[%s1863_s1 + $0x1b0] ss:$8 sps:$4 sm:$0xff]  }
  0x12   :  { %539 = vmatprep.mubr.bf16.mxu1 %v1251_v46  ;;  %v1227_v51 = vld [vmem:[%s1863_s1 + $0xc0] ss:$8 sps:$4 sm:$0xff]   ;;  %v1234_v52 = vld [vmem:[%s1863_s1 + $0x1c4] ss:$8 sps:$4 sm:$0xff]   ;;  %v1231_v53 = vld [vmem:[%s1863_s1 + $0xd4] ss:$8 sps:$4 sm:$0xff]  }
  0x13   :  { %516 = vmatpush1.bf16.msra.mxu1 %v1179_v17  ;;  %v1236_v54 = vld [vmem:[%s1863_s1 + $0x1c0] ss:$8 sps:$4 sm:$0xff]   ;;  %v1233_v55 = vld [vmem:[%s1863_s1 + $0xd0] ss:$8 sps:$4 sm:$0xff]   ;;  %v1240_v56 = vld [vmem:[%s1863_s1 + $0x1d4] ss:$8 sps:$4 sm:$0xff]  }
  0x14   :  { %517 = vmatprep.subr.bf16.mxu1 %v1183_v19  ;;  %599 = vmatpush1.bf16.msra.mxu0 %v1188_v20  ;;  %v1237_v57 = vld [vmem:[%s1863_s1 + $0xe4] ss:$8 sps:$4 sm:$0xff]  }
  0x15   :  { %600 = vmatprep.subr.bf16.mxu0 %v1192_v22 }
  0x17   :  { %518 = vmatpush1.bf16.msra.mxu1 %v1185_v21 }
  0x18   :  { %519 = vmatprep.subr.bf16.mxu1 %v1189_v23  ;;  %601 = vmatpush1.bf16.msra.mxu0 %v1194_v24 }
  0x19   :  { %602 = vmatprep.subr.bf16.mxu0 %v1198_v26 }
  0x1b   :  { %520 = vmatpush1.bf16.msra.mxu1 %v1191_v25 }
  0x1c   :  { %521 = vmatprep.subr.bf16.mxu1 %v1195_v27  ;;  %603 = vmatpush1.bf16.msra.mxu0 %v1200_v28 }
  0x1d   :  { %604 = vmatprep.subr.bf16.mxu0 %v1204_v30 }
  0x1f   :  { %522 = vmatpush1.bf16.msra.mxu1 %v1197_v29 }
  0x20   :  { %523 = vmatprep.subr.bf16.mxu1 %v1201_v31  ;;  %605 = vmatpush1.bf16.msra.mxu0 %v1206_v32 }
  0x21   :  { %606 = vmatprep.subr.bf16.mxu0 %v1210_v34 }
  0x23   :  { %524 = vmatpush1.bf16.msra.mxu1 %v1203_v33 }
  0x24   :  { %525 = vmatprep.subr.bf16.mxu1 %v1207_v35  ;;  %607 = vmatpush1.bf16.msra.mxu0 %v1212_v36 }
  0x25   :  { %608 = vmatprep.subr.bf16.mxu0 %v1216_v38 }
  0x27   :  { %526 = vmatpush1.bf16.msra.mxu1 %v1209_v37 }
  0x28   :  { %527 = vmatprep.subr.bf16.mxu1 %v1213_v39  ;;  %609 = vmatpush1.bf16.msra.mxu0 %v1218_v41 }
  0x29   :  { %610 = vmatprep.subr.bf16.mxu0 %v1222_v42 }
  0x2b   :  { %528 = vmatpush1.bf16.msra.mxu1 %v1215_v40 }
  0x2c   :  { %529 = vmatprep.subr.bf16.mxu1 %v1219_v43  ;;  %611 = vmatpush1.bf16.msra.mxu0 %v1224_v45 }
  0x2d   :  { %612 = vmatprep.subr.bf16.mxu0 %v1228_v48 }
  0x2f   :  { %530 = vmatpush1.bf16.msra.mxu1 %v1221_v47 }
  0x30   :  { %531 = vmatprep.subr.bf16.mxu1 %v1225_v49  ;;  %613 = vmatpush1.bf16.msra.mxu0 %v1230_v50 }
  0x31   :  { %614 = vmatprep.subr.bf16.mxu0 %v1234_v52 }
  0x33   :  { %532 = vmatpush1.bf16.msra.mxu1 %v1227_v51 }
  0x34   :  { %533 = vmatprep.subr.bf16.mxu1 %v1231_v53 }
  0x35   :  { %8 = vsyncpa [#allocation3], 0  ;;  %615 = vmatpush1.bf16.msra.mxu0 %v1236_v54  ;;  %v1242_v58 = vld [vmem:[%s1863_s1 + $0x1d0] ss:$8 sps:$4 sm:$0xff]   ;;  %v1239_v59 = vld [vmem:[%s1863_s1 + $0xe0] ss:$8 sps:$4 sm:$0xff]  }
  0x36   :  { %616 = vmatprep.subr.bf16.mxu0 %v1240_v56  ;;  %v1243_v60 = vld [vmem:[%s1863_s1 + $0xf4] ss:$8 sps:$4 sm:$0xff]   ;;  %v1245_v61 = vld [vmem:[%s1862_s0 + $0x8] ss:$16 sps:$4 sm:$0xff]   ;;  %v1249_v0 = vld [vmem:[%s1862_s0] ss:$16 sps:$4 sm:$0xff]  }
  0x37   :  { %534 = vmatpush1.bf16.msra.mxu1 %v1233_v55  ;;  %v1252_v62 = vld [vmem:[%s1862_s0 + $0x2c] ss:$16 sps:$4 sm:$0xff]   ;;  %v1248_v63 = vld [vmem:[%s1863_s1 + $0xf0] ss:$8 sps:$4 sm:$0xff]   ;;  %v1255_v1 = vld [vmem:[%s1862_s0 + $0x24] ss:$16 sps:$4 sm:$0xff]  }
  0x38   :  { %535 = vmatprep.subr.bf16.mxu1 %v1237_v57  ;;  %v1254_v2 = vld [vmem:[%s1862_s0 + $0x28] ss:$16 sps:$4 sm:$0xff]   ;;  %v1258_v3 = vld [vmem:[%s1862_s0 + $0x4c] ss:$16 sps:$4 sm:$0xff]   ;;  %v1257_v4 = vld [vmem:[%s1862_s0 + $0x20] ss:$16 sps:$4 sm:$0xff]  }
  0x39   :  { %617 = vmatpush1.bf16.msra.mxu0 %v1242_v58  ;;  %v1261_v5 = vld [vmem:[%s1862_s0 + $0x44] ss:$16 sps:$4 sm:$0xff]   ;;  %v1260_v6 = vld [vmem:[%s1862_s0 + $0x48] ss:$16 sps:$4 sm:$0xff]   ;;  %v1264_v7 = vld [vmem:[%s1862_s0 + $0x6c] ss:$16 sps:$4 sm:$0xff]  }
  0x3a   :  { %v1263_v8 = vld [vmem:[%s1862_s0 + $0x40] ss:$16 sps:$4 sm:$0xff]   ;;  %v1267_v9 = vld [vmem:[%s1862_s0 + $0x64] ss:$16 sps:$4 sm:$0xff]   ;;  %v1266_v10 = vld [vmem:[%s1862_s0 + $0x68] ss:$16 sps:$4 sm:$0xff]  }
  0x3b   :  { %536 = vmatpush1.bf16.msra.mxu1 %v1239_v59  ;;  %v1270_v11 = vld [vmem:[%s1862_s0 + $0x8c] ss:$16 sps:$4 sm:$0xff]   ;;  %v1269_v12 = vld [vmem:[%s1862_s0 + $0x60] ss:$16 sps:$4 sm:$0xff]   ;;  %v1273_v13 = vld [vmem:[%s1862_s0 + $0x84] ss:$16 sps:$4 sm:$0xff]  }
  0x3c   :  { %537 = vmatprep.subr.bf16.mxu1 %v1243_v60  ;;  %623 = vmatmul.mubr.bf16.vlgmr.msra.gmra.mrb[0].mxu0 %v1245_v61  ;;  %v1272_v14 = vld [vmem:[%s1862_s0 + $0x88] ss:$16 sps:$4 sm:$0xff]   ;;  %v1275_v15 = vld [vmem:[%s1862_s0 + $0x80] ss:$16 sps:$4 sm:$0xff]   ;;  %vm673_vm1 = vcmask 556032  }
  0x3d   :  { %1121 = vmatprep.mubr.msk.bf16.mxu0 %vm491_vm0, %v1252_v62 }
  0x3f   :  { %538 = vmatpush1.bf16.msra.mxu1 %v1248_v63 }
  0x42   :  { %540 = vmatmul.mubr.bf16.vlgmr.msra.gmra.mrb[0].mxu1 %v1249_v0 }
  0x43   :  { %549 = vmatprep.mubr.bf16.mxu1 %v1255_v1 }
  0x44   :  { %633 = vmatmul.mubr.bf16.gmra.mrb[4].mxu0 %v1254_v2 }
  0x45   :  { %1122 = vmatprep.mubr.msk.bf16.mxu0 %vm491_vm0, %v1258_v3 }
  0x4a   :  { %550 = vmatmul.mubr.bf16.gmra.mrb[4].mxu1 %v1257_v4 }
  0x4b   :  { %559 = vmatprep.mubr.bf16.mxu1 %v1261_v5 }
  0x4c   :  { %643 = vmatmul.mubr.bf16.gmra.mrb[8].mxu0 %v1260_v6 }
  0x4d   :  { %1123 = vmatprep.mubr.msk.bf16.mxu0 %vm491_vm0, %v1264_v7 }
  0x52   :  { %560 = vmatmul.mubr.bf16.gmra.mrb[8].mxu1 %v1263_v8 }
  0x53   :  { %569 = vmatprep.mubr.bf16.mxu1 %v1267_v9 }
  0x54   :  { %653 = vmatmul.mubr.bf16.gmra.mrb[12].mxu0 %v1266_v10 }
  0x55   :  { %1124 = vmatprep.mubr.msk.bf16.mxu0 %vm491_vm0, %v1270_v11 }
  0x5a   :  { %570 = vmatmul.mubr.bf16.gmra.mrb[12].mxu1 %v1269_v12 }
  0x5b   :  { %579 = vmatprep.mubr.bf16.mxu1 %v1273_v13 }
  0x5c   :  { %663 = vmatmul.mubr.bf16.gmra.mrb[16].mxu0 %v1272_v14 }
  0x62   :  { %580 = vmatmul.mubr.bf16.gmra.mrb[16].mxu1 %v1275_v15 }
 0x10f   :  { %v624_v16 = vpop.f32.mrb[0].mxu0 }
 0x110   :  { %v626_v17 = vpop.f32.mrb[1].mxu0 }
 0x111   :  { %v628_v18 = vpop.f32.mrb[2].mxu0 }
 0x112   :  { %v630_v19 = vpop.f32.mrb[3].mxu0 }
 0x115   :  { %v541_v20 = vpop.f32.mrb[0].mxu1 }
 0x116   :  { %v1590_v21 = vadd.f32 %v624_v16, %v541_v20  ;;  %v543_v22 = vpop.f32.mrb[1].mxu1 }
 0x117   :  { %v1592_v23 = vadd.f32 %v626_v17, %v543_v22  ;;  %v545_v24 = vpop.f32.mrb[2].mxu1  ;;  %v634_v27 = vpop.f32.mrb[4].mxu0 }
 0x118   :  { %v1594_v25 = vadd.f32 %v628_v18, %v545_v24  ;;  %v547_v26 = vpop.f32.mrb[3].mxu1  ;;  %v636_v29 = vpop.f32.mrb[5].mxu0 }
 0x119   :  { %v1596_v28 = vadd.f32 %v630_v19, %v547_v26  ;;  %v674_v30 = vsel %vm673_vm1, %v1592_v23, 0.0  ;;  %v638_v31 = vpop.f32.mrb[6].mxu0 }
 0x11a   :  { %v675_v32 = vadd.f32 %v674_v30, %v1590_v21  ;;  %v640_v33 = vpop.f32.mrb[7].mxu0 }
 0x11b   :  { %v678_v34 = vsel %vm673_vm1, %v1596_v28, 0.0 }
 0x11c   :  { %676 = vadd.xlane.f32.xlu0 %v675_v32  ;;  %v679_v38 = vadd.f32 %v678_v34, %v1594_v25 }
 0x11d   :  { %v551_v35 = vpop.f32.mrb[4].mxu1 }
 0x11e   :  { %v1603_v36 = vadd.f32 %v634_v27, %v551_v35  ;;  %v553_v37 = vpop.f32.mrb[5].mxu1 }
 0x11f   :  { %v1606_v39 = vadd.f32 %v636_v29, %v553_v37  ;;  %v555_v40 = vpop.f32.mrb[6].mxu1  ;;  %v644_v43 = vpop.f32.mrb[8].mxu0  ;;  %v1320_v37 = vmov 1  }
 0x120   :  { %v1608_v41 = vadd.f32 %v638_v31, %v555_v40  ;;  %680 = vadd.xlane.f32.xlu0 %v679_v38  ;;  %v557_v42 = vpop.f32.mrb[7].mxu1  ;;  %v646_v45 = vpop.f32.mrb[9].mxu0  ;;  %1150 = vset.pattern.permute.xlu1 %v1320_v37 }
 0x121   :  { %v1610_v44 = vadd.f32 %v640_v33, %v557_v42  ;;  %v682_v46 = vsel %vm673_vm1, %v1606_v39, 0.0  ;;  %v648_v47 = vpop.f32.mrb[10].mxu0  ;;  %1151 = vset.pattern.permute.xlu0 %v1320_v37 }
 0x122   :  { %v683_v48 = vadd.f32 %v682_v46, %v1603_v36  ;;  %v650_v49 = vpop.f32.mrb[11].mxu0 }
 0x123   :  { %v686_v50 = vsel %vm673_vm1, %v1610_v44, 0.0 }
 0x124   :  { %684 = vadd.xlane.f32.xlu1 %v683_v48  ;;  %v687_v54 = vadd.f32 %v686_v50, %v1608_v41 }
 0x125   :  { %v561_v51 = vpop.f32.mrb[8].mxu1 }
 0x126   :  { %v1617_v52 = vadd.f32 %v644_v43, %v561_v51  ;;  %v563_v53 = vpop.f32.mrb[9].mxu1 }
 0x127   :  { %v1620_v55 = vadd.f32 %v646_v45, %v563_v53  ;;  %v565_v56 = vpop.f32.mrb[10].mxu1  ;;  %v654_v59 = vpop.f32.mrb[12].mxu0 }
 0x128   :  { %v1622_v57 = vadd.f32 %v648_v47, %v565_v56  ;;  %688 = vadd.xlane.f32.xlu1 %v687_v54  ;;  %v567_v58 = vpop.f32.mrb[11].mxu1  ;;  %v656_v61 = vpop.f32.mrb[13].mxu0 }
 0x129   :  { %v1624_v60 = vadd.f32 %v650_v49, %v567_v58  ;;  %v690_v62 = vsel %vm673_vm1, %v1620_v55, 0.0  ;;  %v658_v63 = vpop.f32.mrb[14].mxu0 }
 0x12a   :  { %v691_v0 = vadd.f32 %v690_v62, %v1617_v52  ;;  %v660_v1 = vpop.f32.mrb[15].mxu0 }
 0x12b   :  { %v694_v2 = vsel %vm673_vm1, %v1624_v60, 0.0 }
 0x12c   :  { %692 = vadd.xlane.f32.xlu0 %v691_v0  ;;  %v695_v3 = vadd.f32 %v694_v2, %v1622_v57 }
 0x12d   :  { %v571_v4 = vpop.f32.mrb[12].mxu1 }
 0x12e   :  { %v1632_v5 = vadd.f32 %v654_v59, %v571_v4  ;;  %696 = vadd.xlane.f32.xlu1 %v695_v3  ;;  %v573_v6 = vpop.f32.mrb[13].mxu1 }
 0x12f   :  { %v1634_v7 = vadd.f32 %v656_v61, %v573_v6  ;;  %v575_v8 = vpop.f32.mrb[14].mxu1  ;;  %v664_v11 = vpop.f32.mrb[16].mxu0 }
 0x130   :  { %v1636_v9 = vadd.f32 %v658_v63, %v575_v8  ;;  %v577_v10 = vpop.f32.mrb[15].mxu1  ;;  %v666_v13 = vpop.f32.mrb[17].mxu0 }
 0x131   :  { %v1638_v12 = vadd.f32 %v660_v1, %v577_v10  ;;  %v698_v14 = vsel %vm673_vm1, %v1634_v7, 0.0  ;;  %v668_v15 = vpop.f32.mrb[18].mxu0 }
 0x132   :  { %v699_v16 = vadd.f32 %v698_v14, %v1632_v5  ;;  %v670_v17 = vpop.f32.mrb[19].mxu0 }
 0x133   :  { %v702_v18 = vsel %vm673_vm1, %v1638_v12, 0.0 }
 0x134   :  { %700 = vadd.xlane.f32.xlu0 %v699_v16  ;;  %v703_v19 = vadd.f32 %v702_v18, %v1636_v9 }
 0x135   :  { %v581_v20 = vpop.f32.mrb[16].mxu1 }
 0x136   :  { %v1646_v22 = vadd.f32 %v664_v11, %v581_v20  ;;  %704 = vadd.xlane.f32.xlu1 %v703_v19  ;;  %v583_v24 = vpop.f32.mrb[17].mxu1 }
 0x137   :  { %v1648_v26 = vadd.f32 %v666_v13, %v583_v24  ;;  %v585_v27 = vpop.f32.mrb[18].mxu1 }
 0x138   :  { %v1650_v29 = vadd.f32 %v668_v15, %v585_v27  ;;  %v587_v30 = vpop.f32.mrb[19].mxu1 }
 0x139   :  { %v1652_v31 = vadd.f32 %v670_v17, %v587_v30  ;;  %v706_v32 = vsel %vm673_vm1, %v1648_v26, 0.0 }
 0x13a   :  { %v707_v33 = vadd.f32 %v706_v32, %v1646_v22 }
 0x13b   :  { %v710_v34 = vsel %vm673_vm1, %v1652_v31, 0.0 }
 0x13c   :  { %708 = vadd.xlane.f32.xlu0 %v707_v33  ;;  %v711_v35 = vadd.f32 %v710_v34, %v1650_v29 }
 0x13e   :  { %712 = vadd.xlane.f32.xlu1 %v711_v35 }
 0x1a9   :  { %v677_v38 = vpop.xlane.xlu0 %676 }
 0x1aa   :  { %v714_v40 = vmul.f32 0.0051020407, %v677_v38 }
 0x1ac   :  { %v1663_v42 = vsub.f32 %v1590_v21, %v714_v40  ;;  %v1666_v43 = vsub.f32 %v1592_v23, %v714_v40 }
 0x1ad   :  { %v681_v45 = vpop.xlane.xlu0 %680 }
 0x1ae   :  { %v715_v46 = vmul.f32 0.0051020407, %v681_v45  ;;  %v744_v47 = vmul.f32 %v1663_v42, %v1663_v42  ;;  %v745_v48 = vmul.f32 %v1666_v43, %v1666_v43 }
 0x1b0   :  { %v1673_v49 = vsub.f32 %v1594_v25, %v715_v46  ;;  %v1676_v50 = vsub.f32 %v1596_v28, %v715_v46  ;;  %v764_v21 = vsel %vm673_vm1, %v745_v48, 0.0 }
 0x1b1   :  { %v685_v51 = vpop.xlane.xlu1 %684  ;;  %v765_v53 = vadd.f32 %v764_v21, %v744_v47 }
 0x1b2   :  { %v716_v23 = vmul.f32 0.0051020407, %v685_v51  ;;  %v746_v54 = vmul.f32 %v1673_v49, %v1673_v49  ;;  %v747_v56 = vmul.f32 %v1676_v50, %v1676_v50 }
 0x1b3   :  { %766 = vadd.xlane.f32.xlu0 %v765_v53 }
 0x1b4   :  { %v1684_v58 = vsub.f32 %v1603_v36, %v716_v23  ;;  %v1687_v25 = vsub.f32 %v1606_v39, %v716_v23  ;;  %v768_v28 = vsel %vm673_vm1, %v747_v56, 0.0 }
 0x1b5   :  { %v689_v59 = vpop.xlane.xlu1 %688  ;;  %v769_v61 = vadd.f32 %v768_v28, %v746_v54 }
 0x1b6   :  { %v717_v62 = vmul.f32 0.0051020407, %v689_v59  ;;  %v748_v63 = vmul.f32 %v1684_v58, %v1684_v58  ;;  %v749_v0 = vmul.f32 %v1687_v25, %v1687_v25 }
 0x1b7   :  { %770 = vadd.xlane.f32.xlu1 %v769_v61 }
 0x1b8   :  { %v1695_v1 = vsub.f32 %v1608_v41, %v717_v62  ;;  %v1698_v36 = vsub.f32 %v1610_v44, %v717_v62  ;;  %v772_v39 = vsel %vm673_vm1, %v749_v0, 0.0  ;;  %v844_v0 = vld [vmem:[%s1864_s2] sm:$0xff] }
 0x1b9   :  { %v693_v2 = vpop.xlane.xlu0 %692  ;;  %v773_v3 = vadd.f32 %v772_v39, %v748_v63  ;;  %v845_v39 = vld [vmem:[%s1864_s2 + $0x8] sm:$0xff] }
 0x1ba   :  { %v718_v4 = vmul.f32 0.0051020407, %v693_v2  ;;  %v750_v6 = vmul.f32 %v1695_v1, %v1695_v1  ;;  %v751_v8 = vmul.f32 %v1698_v36, %v1698_v36  ;;  %v846_v2 = vld [vmem:[%s1864_s2 + $0x10] sm:$0xff] }
 0x1bb   :  { %v697_v10 = vpop.xlane.xlu1 %696  ;;  %774 = vadd.xlane.f32.xlu0 %v773_v3  ;;  %v1784_v3 = vld [vmem:[%s1864_s2 + $0x20] sm:$0xff] }
 0x1bc   :  { %v1706_v11 = vsub.f32 %v1617_v52, %v718_v4  ;;  %v1709_v41 = vsub.f32 %v1620_v55, %v718_v4  ;;  %v719_v44 = vmul.f32 0.0051020407, %v697_v10  ;;  %v776_v13 = vsel %vm673_vm1, %v751_v8, 0.0  ;;  %v847_v4 = vld [vmem:[%s1864_s2 + $0x18] sm:$0xff]  ;;  %v1798_v8 = vld [vmem:[%s1864_s2 + $0x28] sm:$0xff] }
 0x1bd   :  { %v777_v14 = vadd.f32 %v776_v13, %v750_v6  ;;  %v1793_v6 = vld [vmem:[%s1864_s2 + $0x30] sm:$0xff]  ;;  %v1805_v10 = vld [vmem:[%s1864_s2 + $0x38] sm:$0xff] }
 0x1be   :  { %v1713_v15 = vsub.f32 %v1622_v57, %v719_v44  ;;  %v1716_v16 = vsub.f32 %v1624_v60, %v719_v44  ;;  %v752_v17 = vmul.f32 %v1706_v11, %v1706_v11  ;;  %v753_v52 = vmul.f32 %v1709_v41, %v1709_v41 }
 0x1bf   :  { %778 = vadd.xlane.f32.xlu1 %v777_v14  ;;  %v1321_v44 = vmov 0  }
 0x1c0   :  { %v780_v55 = vsel %vm673_vm1, %v753_v52, 0.0  ;;  %v754_v18 = vmul.f32 %v1713_v15, %v1713_v15  ;;  %v755_v19 = vmul.f32 %v1716_v16, %v1716_v16 }
 0x1c1   :  { %v701_v57 = vpop.xlane.xlu0 %700  ;;  %v781_v20 = vadd.f32 %v780_v55, %v752_v17 }
 0x1c2   :  { %v720_v24 = vmul.f32 0.0051020407, %v701_v57  ;;  %v784_v60 = vsel %vm673_vm1, %v755_v19, 0.0 }
 0x1c3   :  { %v705_v27 = vpop.xlane.xlu1 %704  ;;  %782 = vadd.xlane.f32.xlu0 %v781_v20  ;;  %v785_v30 = vadd.f32 %v784_v60, %v754_v18 }
 0x1c4   :  { %v1729_v32 = vsub.f32 %v1632_v5, %v720_v24  ;;  %v1732_v33 = vsub.f32 %v1634_v7, %v720_v24  ;;  %v721_v34 = vmul.f32 0.0051020407, %v705_v27 }
 0x1c5   :  { %786 = vadd.xlane.f32.xlu1 %v785_v30 }
 0x1c6   :  { %v1735_v35 = vsub.f32 %v1636_v9, %v721_v34  ;;  %v1738_v38 = vsub.f32 %v1638_v12, %v721_v34  ;;  %v756_v40 = vmul.f32 %v1729_v32, %v1729_v32  ;;  %v757_v45 = vmul.f32 %v1732_v33, %v1732_v33 }
 0x1c8   :  { %v788_v5 = vsel %vm673_vm1, %v757_v45, 0.0  ;;  %v758_v7 = vmul.f32 %v1735_v35, %v1735_v35  ;;  %v759_v46 = vmul.f32 %v1738_v38, %v1738_v38 }
 0x1c9   :  { %v709_v47 = vpop.xlane.xlu0 %708  ;;  %v789_v9 = vadd.f32 %v788_v5, %v756_v40 }
 0x1ca   :  { %v722_v48 = vmul.f32 0.0051020407, %v709_v47  ;;  %v792_v12 = vsel %vm673_vm1, %v759_v46, 0.0 }
 0x1cb   :  { %790 = vadd.xlane.f32.xlu0 %v789_v9  ;;  %v713_v21 = vpop.xlane.xlu1 %712  ;;  %v793_v51 = vadd.f32 %v792_v12, %v758_v7 }
 0x1cc   :  { %v1751_v53 = vsub.f32 %v1646_v22, %v722_v48  ;;  %v1754_v23 = vsub.f32 %v1648_v26, %v722_v48  ;;  %v723_v54 = vmul.f32 0.0051020407, %v713_v21 }
 0x1cd   :  { %794 = vadd.xlane.f32.xlu1 %v793_v51 }
 0x1ce   :  { %v1757_v56 = vsub.f32 %v1650_v29, %v723_v54  ;;  %v1760_v28 = vsub.f32 %v1652_v31, %v723_v54  ;;  %v760_v59 = vmul.f32 %v1751_v53, %v1751_v53  ;;  %v761_v61 = vmul.f32 %v1754_v23, %v1754_v23 }
 0x1d0   :  { %v796_v22 = vsel %vm673_vm1, %v761_v61, 0.0  ;;  %v762_v26 = vmul.f32 %v1757_v56, %v1757_v56  ;;  %v763_v62 = vmul.f32 %v1760_v28, %v1760_v28 }
 0x1d1   :  { %v797_v63 = vadd.f32 %v796_v22, %v760_v59 }
 0x1d2   :  { %v800_v29 = vsel %vm673_vm1, %v763_v62, 0.0 }
 0x1d3   :  { %798 = vadd.xlane.f32.xlu0 %v797_v63  ;;  %v801_v31 = vadd.f32 %v800_v29, %v762_v26 }
 0x1d5   :  { %802 = vadd.xlane.f32.xlu1 %v801_v31 }
 0x1e6   :  { %936 = vperm.xlu1 %1150, %v844_v0  }
 0x1e9   :  { %941 = vperm.xlu0 %1151, %v845_v39  }
 0x1ea   :  { %946 = vperm.xlu1 %1150, %v846_v2  }
 0x1ed   :  { %956 = vperm.xlu0 %1151, %v1784_v3  }
 0x1ee   :  { %951 = vperm.xlu1 %1150, %v847_v4  }
 0x1f1   :  { %966 = vperm.xlu0 %1151, %v1793_v6  }
 0x1f2   :  { %961 = vperm.xlu1 %1150, %v1798_v8  }
 0x1f5   :  { %1152 = vset.pattern.permute.xlu0 %v1321_v44 }
 0x1f6   :  { %971 = vperm.xlu1 %1150, %v1805_v10  }
 0x1fa   :  { %1153 = vset.pattern.permute.xlu1 %v1321_v44 }
 0x240   :  { %v767_v13 = vpop.xlane.xlu0 %766 }
 0x241   :  { %v804_v14 = vmul.f32 0.0051020407, %v767_v13 }
 0x243   :  { %v814_v17 = vmax.f32 %v804_v14, 0.0 }
 0x244   :  { %v771_v52 = vpop.xlane.xlu1 %770 }
 0x245   :  { %v824_v55 = vadd.f32 1e-05, %v814_v17  ;;  %v805_v18 = vmul.f32 0.0051020407, %v771_v52 }
 0x247   :  { %1276 = vrsqrt.f32 %v824_v55  ;;  %v815_v19 = vmax.f32 %v805_v18, 0.0 }
 0x248   :  { %v775_v57 = vpop.xlane.xlu0 %774 }
 0x249   :  { %v825_v20 = vadd.f32 1e-05, %v815_v19  ;;  %v806_v24 = vmul.f32 0.0051020407, %v775_v57 }
 0x24b   :  { %1278 = vrsqrt.f32 %v825_v20  ;;  %v816_v60 = vmax.f32 %v806_v24, 0.0 }
 0x24c   :  { %v779_v27 = vpop.xlane.xlu1 %778 }
 0x24d   :  { %v826_v30 = vadd.f32 1e-05, %v816_v60  ;;  %v807_v34 = vmul.f32 0.0051020407, %v779_v27 }
 0x24f   :  { %1280 = vrsqrt.f32 %v826_v30  ;;  %v817_v40 = vmax.f32 %v807_v34, 0.0 }
 0x250   :  { %v783_v45 = vpop.xlane.xlu0 %782 }
 0x251   :  { %v1277_v5 = vpop.eup %1276  ;;  %v827_v7 = vadd.f32 1e-05, %v817_v40  ;;  %v808_v46 = vmul.f32 0.0051020407, %v783_v45 }
 0x252   :  { %v787_v47 = vpop.xlane.xlu1 %786  ;;  %v854_v9 = vmul.f32 %v1277_v5, %v844_v0 }
 0x253   :  { %1282 = vrsqrt.f32 %v827_v7  ;;  %v818_v48 = vmax.f32 %v808_v46, 0.0  ;;  %v809_v12 = vmul.f32 0.0051020407, %v787_v47 }
 0x254   :  { %866 = vperm.xlu0 %1152, %v854_v9  }
 0x255   :  { %v1279_v21 = vpop.eup %1278  ;;  %v828_v51 = vadd.f32 1e-05, %v818_v48  ;;  %v819_v54 = vmax.f32 %v809_v12, 0.0 }
 0x256   :  { %v855_v59 = vmul.f32 %v1279_v21, %v845_v39 }
 0x257   :  { %1284 = vrsqrt.f32 %v828_v51  ;;  %v829_v61 = vadd.f32 1e-05, %v819_v54 }
 0x258   :  { %v791_v22 = vpop.xlane.xlu0 %790  ;;  %871 = vperm.xlu1 %1153, %v855_v59  }
 0x259   :  { %v1281_v26 = vpop.eup %1280  ;;  %1286 = vrsqrt.f32 %v829_v61  ;;  %v810_v62 = vmul.f32 0.0051020407, %v791_v22 }
 0x25a   :  { %v795_v63 = vpop.xlane.xlu1 %794  ;;  %v856_v29 = vmul.f32 %v1281_v26, %v846_v2 }
 0x25b   :  { %v820_v31 = vmax.f32 %v810_v62, 0.0  ;;  %v811_v44 = vmul.f32 0.0051020407, %v795_v63 }
 0x25c   :  { %876 = vperm.xlu1 %1153, %v856_v29  }
 0x25d   :  { %v1283_v0 = vpop.eup %1282  ;;  %v830_v13 = vadd.f32 1e-05, %v820_v31  ;;  %v821_v14 = vmax.f32 %v811_v44, 0.0 }
 0x25e   :  { %v857_v17 = vmul.f32 %v1283_v0, %v847_v4 }
 0x25f   :  { %1288 = vrsqrt.f32 %v830_v13  ;;  %v831_v52 = vadd.f32 1e-05, %v821_v14 }
 0x260   :  { %v799_v55 = vpop.xlane.xlu0 %798  ;;  %881 = vperm.xlu1 %1153, %v857_v17  }
 0x261   :  { %v1285_v39 = vpop.eup %1284  ;;  %1290 = vrsqrt.f32 %v831_v52  ;;  %v812_v18 = vmul.f32 0.0051020407, %v799_v55 }
 0x262   :  { %v803_v19 = vpop.xlane.xlu1 %802  ;;  %v858_v57 = vmul.f32 %v1285_v39, %v1784_v3  ;;  %v852_v3 = vld [vmem:[%s1864_s2 + $0x40] sm:$0xff] }
 0x263   :  { %v1287_v20 = vpop.eup %1286  ;;  %v822_v24 = vmax.f32 %v812_v18, 0.0  ;;  %v813_v2 = vmul.f32 0.0051020407, %v803_v19 }
 0x264   :  { %886 = vperm.xlu1 %1153, %v858_v57   ;;  %v859_v30 = vmul.f32 %v1287_v20, %v1798_v8  ;;  %v853_v8 = vld [vmem:[%s1864_s2 + $0x48] sm:$0xff]  ;;  %s1322_s2 = smov [#allocation2]  }
 0x265   :  { %v832_v60 = vadd.f32 1e-05, %v822_v24  ;;  %v823_v27 = vmax.f32 %v813_v2, 0.0  ;;  %s1029_s27 = sshll.u32 %s1322_s2, 4  ;;  %s1030_s27 = int_to_ptr.vmem [resolvable:$true] %s1029_s27 }
 0x266   :  { %s1296_s28 = scalar_lea.vmem %s1030_s27, 2560  ;;  %p1301_p1 = scmp.lt.s32.totalorder %s1030_s27, %s1030_s27 }
 0x267   :  { %1292 = vrsqrt.f32 %v832_v60  ;;  %v833_v4 = vadd.f32 1e-05, %v823_v27  ;;  %p1297_p0 = scmp.ne.s32.totalorder %s1030_s27, %s1296_s28  ;;  %p1302_p2 = scmp.lt.s32.totalorder %s1296_s28, %s1296_s28 }
 0x268   :  { %891 = vperm.xlu1 %1153, %v859_v30   ;;  %v942_v48 = vpop.permute.xlu0 %941 }
 0x269   :  { %v1289_v34 = vpop.eup %1288  ;;  %1294 = vrsqrt.f32 %v833_v4  ;;  %p1303_p3 = por %p1302_p2, %p1301_p1 }
 0x26a   :  { %v860_v40 = vmul.f32 %v1289_v34, %v1793_v6  ;;  %v937_v6 = vpop.permute.xlu1 %936 }
 0x26b   :  { %v1291_v45 = vpop.eup %1290  ;;  %p1304_p4 = pnand %p1303_p3, %p1297_p0 }
 0x26c   :  { %896 = vperm.xlu1 %1153, %v860_v40   ;;  %v861_v5 = vmul.f32 %v1291_v45, %v1805_v10  ;;  %v957_v21 = vpop.permute.xlu0 %956 }
 0x26e   :  { %v947_v10 = vpop.permute.xlu1 %946 }
 0x270   :  { %901 = vperm.xlu1 %1153, %v861_v5   ;;  %v967_v54 = vpop.permute.xlu0 %966 }
 0x271   :  { %v1293_v7 = vpop.eup %1292 }
 0x272   :  { %v862_v46 = vmul.f32 %v1293_v7, %v852_v3  ;;  %v952_v12 = vpop.permute.xlu1 %951 }
 0x273   :  { %v1295_v47 = vpop.eup %1294 }
 0x274   :  { %906 = vperm.xlu1 %1153, %v862_v46   ;;  %v863_v9 = vmul.f32 %v1295_v47, %v853_v8 }
 0x276   :  { %911 = vperm.xlu0 %1152, %v863_v9   ;;  %v962_v51 = vpop.permute.xlu1 %961 }
 0x278   :  { %1155 = vset.pattern.permute.xlu1 %v1320_v37 }
 0x279   :  { %981 = vperm.xlu1 %1155, %v853_v8  }
 0x27a   :  { %1154 = vset.pattern.permute.xlu0 %v1320_v37  ;;  %v972_v59 = vpop.permute.xlu1 %971 }
 0x27b   :  { %976 = vperm.xlu0 %1154, %v852_v3  }
 0x2d3   :  { %v867_v61 = vpop.permute.xlu0 %866 }
 0x2d4   :  { %v914_v22 = vmul.f32 %v867_v61, %v1663_v42  ;;  %v915_v26 = vmul.f32 %v867_v61, %v1666_v43 }
 0x2d6   :  { %v984_v62 = vadd.f32 %v937_v6, %v914_v22  ;;  %v985_v63 = vadd.f32 %v937_v6, %v915_v26 }
 0x2d7   :  { %v872_v29 = vpop.permute.xlu1 %871 }
 0x2d8   :  { %1004 = vst [vmem:[#allocation2] sm:$0xff] %v984_v62  ;;  %1005 = vst.msk [vmem:[#allocation2 + $0x8] sm:$0xff] %vm673_vm1, %v985_v63  ;;  %v916_v37 = vmul.f32 %v872_v29, %v1673_v49  ;;  %v917_v31 = vmul.f32 %v872_v29, %v1676_v50 }
 0x2da   :  { %v986_v44 = vadd.f32 %v942_v48, %v916_v37  ;;  %v987_v0 = vadd.f32 %v942_v48, %v917_v31 }
 0x2db   :  { %v877_v13 = vpop.permute.xlu1 %876 }
 0x2dc   :  { %1006 = vst [vmem:[#allocation2 + $0x10] sm:$0xff] %v986_v44  ;;  %1007 = vst.msk [vmem:[#allocation2 + $0x18] sm:$0xff] %vm673_vm1, %v987_v0  ;;  %v918_v42 = vmul.f32 %v877_v13, %v1684_v58  ;;  %v919_v43 = vmul.f32 %v877_v13, %v1687_v25 }
 0x2de   :  { %v988_v14 = vadd.f32 %v947_v10, %v918_v42  ;;  %v989_v17 = vadd.f32 %v947_v10, %v919_v43 }
 0x2df   :  { %v882_v52 = vpop.permute.xlu1 %881 }
 0x2e0   :  { %1008 = vst [vmem:[#allocation2 + $0x20] sm:$0xff] %v988_v14  ;;  %1009 = vst.msk [vmem:[#allocation2 + $0x28] sm:$0xff] %vm673_vm1, %v989_v17  ;;  %v920_v49 = vmul.f32 %v882_v52, %v1695_v1  ;;  %v921_v50 = vmul.f32 %v882_v52, %v1698_v36 }
 0x2e2   :  { %v990_v55 = vadd.f32 %v952_v12, %v920_v49  ;;  %v991_v39 = vadd.f32 %v952_v12, %v921_v50 }
 0x2e3   :  { %v887_v18 = vpop.permute.xlu1 %886 }
 0x2e4   :  { %1010 = vst [vmem:[#allocation2 + $0x30] sm:$0xff] %v990_v55  ;;  %1011 = vst.msk [vmem:[#allocation2 + $0x38] sm:$0xff] %vm673_vm1, %v991_v39  ;;  %v922_v58 = vmul.f32 %v887_v18, %v1706_v11  ;;  %v923_v25 = vmul.f32 %v887_v18, %v1709_v41 }
 0x2e6   :  { %v992_v19 = vadd.f32 %v957_v21, %v922_v58  ;;  %v993_v57 = vadd.f32 %v957_v21, %v923_v25 }
 0x2e7   :  { %v892_v20 = vpop.permute.xlu1 %891 }
 0x2e8   :  { %1012 = vst [vmem:[#allocation2 + $0x40] sm:$0xff] %v992_v19  ;;  %1013 = vst.msk [vmem:[#allocation2 + $0x48] sm:$0xff] %vm673_vm1, %v993_v57  ;;  %v924_v1 = vmul.f32 %v892_v20, %v1713_v15  ;;  %v925_v36 = vmul.f32 %v892_v20, %v1716_v16 }
 0x2ea   :  { %v994_v24 = vadd.f32 %v962_v51, %v924_v1  ;;  %v995_v2 = vadd.f32 %v962_v51, %v925_v36 }
 0x2eb   :  { %v897_v60 = vpop.permute.xlu1 %896 }
 0x2ec   :  { %1014 = vst [vmem:[#allocation2 + $0x50] sm:$0xff] %v994_v24  ;;  %1015 = vst.msk [vmem:[#allocation2 + $0x58] sm:$0xff] %vm673_vm1, %v995_v2  ;;  %v926_v11 = vmul.f32 %v897_v60, %v1729_v32  ;;  %v927_v41 = vmul.f32 %v897_v60, %v1732_v33 }
 0x2ee   :  { %v996_v27 = vadd.f32 %v967_v54, %v926_v11  ;;  %v997_v30 = vadd.f32 %v967_v54, %v927_v41 }
 0x2ef   :  { %v902_v4 = vpop.permute.xlu1 %901 }
 0x2f0   :  { %1016 = vst [vmem:[#allocation2 + $0x60] sm:$0xff] %v996_v27  ;;  %1017 = vst.msk [vmem:[#allocation2 + $0x68] sm:$0xff] %vm673_vm1, %v997_v30  ;;  %v928_v15 = vmul.f32 %v902_v4, %v1735_v35  ;;  %v929_v16 = vmul.f32 %v902_v4, %v1738_v38 }
 0x2f2   :  { %v998_v34 = vadd.f32 %v972_v59, %v928_v15  ;;  %v999_v40 = vadd.f32 %v972_v59, %v929_v16 }
 0x2f3   :  { %v907_v45 = vpop.permute.xlu1 %906 }
 0x2f4   :  { %1018 = vst [vmem:[#allocation2 + $0x70] sm:$0xff] %v998_v34  ;;  %1019 = vst.msk [vmem:[#allocation2 + $0x78] sm:$0xff] %vm673_vm1, %v999_v40  ;;  %v930_v7 = vmul.f32 %v907_v45, %v1751_v53  ;;  %v931_v35 = vmul.f32 %v907_v45, %v1754_v23 }
 0x2f5   :  { %v912_v5 = vpop.permute.xlu0 %911 }
 0x2f6   :  { %v932_v32 = vmul.f32 %v912_v5, %v1757_v56  ;;  %v933_v33 = vmul.f32 %v912_v5, %v1760_v28 }
 0x2f8   :  { %v982_v3 = vpop.permute.xlu1 %981 }
 0x2f9   :  { %v1002_v8 = vadd.f32 %v982_v3, %v932_v32  ;;  %v1003_v38 = vadd.f32 %v982_v3, %v933_v33 }
 0x2fa   :  { %v977_v46 = vpop.permute.xlu0 %976 }
 0x2fb   :  { %1022 = vst [vmem:[#allocation2 + $0x90] sm:$0xff] %v1002_v8  ;;  %1023 = vst.msk [vmem:[#allocation2 + $0x98] sm:$0xff] %vm673_vm1, %v1003_v38  ;;  %v1000_v47 = vadd.f32 %v977_v46, %v930_v7  ;;  %v1001_v9 = vadd.f32 %v977_v46, %v931_v35 }
 0x2fd   :  { %1020 = vst [vmem:[#allocation2 + $0x80] sm:$0xff] %v1000_v47  ;;  %1021 = vst.msk [vmem:[#allocation2 + $0x88] sm:$0xff] %vm673_vm1, %v1001_v9 }
 0x2fe   :  { %1307 = shalt.err (!%p1304_p4)
}
 0x2ff   :  { %s1308_s4 = scalar_lea.hbm %s1865_s3, 2560 }
 0x300   :  { %p1309_p5 = scmp.ne.s32.totalorder %s1865_s3, %s1308_s4  ;;  %p1312_p6 = scmp.lt.u32.totalorder %s1308_s4, %s1865_s3 }
 0x302   :  { %p1314_p7 = pnand %p1312_p6, %p1309_p5 }
 0x304   :  { %1317 = shalt.err (!%p1314_p7)
}
 0x305   :  { %s1323_s0 = smov 256   ;;  %s1324_s9 = smov 16  }
 0x306   :  { %1035 = dma.vmem_to_hbm [thread:$0]  %s1030_s27, 2560, %s1865_s3, [#allocation3], %s1323_s0, %s1323_s0, %s1324_s9  }
 0x307   :  { %1318 = dma.done.wait [#allocation3], 2560  }
 0x308   :  { %1319 = vsyncadd [#allocation3], 4294964736 }
 0x309   :  { %1039 = vsyncpa [#allocation3], 1 }

</bundles_post_ra>
